<compile_context>
chip_gen: v7x
topology: tpu7x:2x2x1
jax: 0.10.0
libtpu: 0.0.40
codegen_flags: <defaults>
</compile_context>

<pallas_src>
import functools

import jax
import jax.numpy as jnp
import numpy as np
from jax import lax
from jax.experimental import pallas as pl
from jax.experimental.pallas import tpu as pltpu

EPS = 1e-5  # nn.BatchNorm1d default eps


def conv_bn_relu_kernel(rhs_ref, w_ref, gb_ref, o_ref, *, n_valid):
    """One Cout-tile of Conv1d (bias-free) -> BatchNorm1d(train stats) -> ReLU.

    rhs_ref: (K*Cin, P)   im2col patches; lanes >= N*Lout are zero padding
    w_ref:   (CT,  K*Cin) conv weight flattened (k-major, c-minor row order)
    gb_ref:  (CT,  2)     packed [gamma, beta] (f32)
    o_ref:   (CT,  P)     lane-dense output slab (padding sliced off in the wrapper)
    n_valid: number of valid lanes (= N*Lout)
    """
    # Single MXU matmul, f32 accumulation.
    acc = jnp.dot(w_ref[...], rhs_ref[...], preferred_element_type=jnp.float32)  # (CT, P)

    # Training-mode BN statistics in one reduction pass (sum and sum-of-squares).
    # Zero-padded lanes add exactly 0 to both sums, so dividing by n_valid is exact.
    inv_n = jnp.float32(1.0 / n_valid)
    s = jnp.sum(acc, axis=1, keepdims=True)
    sq = jnp.sum(acc * acc, axis=1, keepdims=True)
    mean = s * inv_n
    var = jnp.maximum(sq * inv_n - mean * mean, 0.0)   # guard tiny negative cancellation
    inv = lax.rsqrt(var + EPS)

    # Fold BN affine into per-channel scale/shift -> one VPU pass over the slab.
    gamma = gb_ref[:, 0:1]
    beta = gb_ref[:, 1:2]
    scale = inv * gamma
    shift = beta - mean * scale
    y = acc * scale + shift

    # ReLU + unmasked lane-dense store.
    o_ref[...] = jnp.maximum(y, 0.0).astype(o_ref.dtype)


def _round_up(x, m):
    return (x + m - 1) // m * m


@functools.partial(jax.jit, static_argnames=("stride", "dilation"))
def conv_block(x, w, b, gamma, beta, *, stride=1, dilation=1):
    """ConvBlock forward. x: (N, Cin, L), w: (Cout, Cin, K) -> (N, Cout, Lout)."""
    assert stride == 1, "only stride=1 (module default) implemented"
    # TODO(synk): stride > 1 needs a strided im2col column gather before the BN reduction.
    del b  # Conv bias is exactly cancelled by training-mode BN mean subtraction.

    N, Cin, L = x.shape
    Cout, _, K = w.shape
    Lout = L - dilation * (K - 1)
    assert Lout > 0
    NLout = N * Lout

    # ---- wrapper-side layout plumbing (no compute hoisted) ---------------------------
    # im2col RHS (K*Cin, N*Lout), k-major / c-minor rows, lane axis zero-padded to a
    # multiple of 128 so the kernel's loads/stores are lane-dense and unmasked.
    xt = jnp.transpose(x, (1, 0, 2))                                   # (Cin, N, L)
    rhs = jnp.concatenate(
        [xt[:, :, k * dilation:k * dilation + Lout].reshape(Cin, NLout)
         for k in range(K)], axis=0)                                   # (K*Cin, NLout)
    P = _round_up(NLout, 128)
    rhs = jnp.pad(rhs, ((0, 0), (0, P - NLout))).astype(x.dtype)

    # Flattened conv weight matching the im2col row order; keep operand dtype == x.dtype
    # so bf16 inputs run the native bf16 MXU path on v6e/v7x.
    w_mat = jnp.transpose(w, (0, 2, 1)).reshape(Cout, K * Cin).astype(x.dtype)

    # gamma/beta packed into one small f32 DMA.
    gb = jnp.stack([gamma, beta], axis=1).astype(jnp.float32)          # (Cout, 2)

    # Cout tile (sublane aligned). Channels are independent for BN, so the grid axis is
    # "parallel" and shards across TensorCores on v7x once Cout exceeds one tile.
    CT = min(_round_up(Cout, 8), 128)
    Cp = _round_up(Cout, CT)
    if Cp != Cout:
        w_mat = jnp.pad(w_mat, ((0, Cp - Cout), (0, 0)))
        gb = jnp.pad(gb, ((0, Cp - Cout), (0, 0)))

    KCin = K * Cin
    x_isz = jnp.dtype(x.dtype).itemsize
    cost = pl.CostEstimate(
        flops=2 * Cp * KCin * P + 6 * Cp * P,
        transcendentals=Cp,
        bytes_accessed=(rhs.size + w_mat.size + Cp * P) * x_isz + gb.size * 4,
    )

    out2d = pl.pallas_call(
        functools.partial(conv_bn_relu_kernel, n_valid=NLout),
        out_shape=jax.ShapeDtypeStruct((Cp, P), x.dtype),
        grid=(Cp // CT,),
        in_specs=[
            pl.BlockSpec((KCin, P), lambda i: (0, 0)),    # im2col slab (same block every step)
            pl.BlockSpec((CT, KCin), lambda i: (i, 0)),   # weight tile
            pl.BlockSpec((CT, 2), lambda i: (i, 0)),      # gamma/beta tile
        ],
        out_specs=pl.BlockSpec((CT, P), lambda i: (i, 0)),
        compiler_params=pltpu.CompilerParams(dimension_semantics=("parallel",)),
        cost_estimate=cost,
    )(rhs, w_mat, gb)
    # TODO(synk): for production N*Lout where the whole slab no longer fits single-buffer
    # in VMEM (especially v7x's 64 MiB), add a lane-tile grid with sum/sum-sq accumulators
    # in VMEM scratch plus a second normalization pass, and set vmem_limit_bytes explicitly.

    # Output layout plumbing back to the module contract (N, Cout, Lout).
    out = out2d[:Cout, :NLout].reshape(Cout, N, Lout)
    return jnp.transpose(out, (1, 0, 2))


def reference(x, w, b, gamma, beta, *, stride=1, dilation=1):
    y = jax.lax.conv_general_dilated(
        x, w, window_strides=(stride,), padding="VALID",
        rhs_dilation=(dilation,), dimension_numbers=("NCH", "OIH", "NCH"))
    y = y + b[None, :, None]
    mean = y.mean(axis=(0, 2), keepdims=True)
    var = ((y - mean) ** 2).mean(axis=(0, 2), keepdims=True)
    y = (y - mean) * jax.lax.rsqrt(var + EPS)
    y = y * gamma[None, :, None] + beta[None, :, None]
    return jnp.maximum(y, 0.0)


if __name__ == "__main__":
    # ConvBlock(input_size=4, output_size=8, kernel_size=3)
    N, Cin, Cout, L, K = 2, 4, 8, 16, 3
    stride, dilation = 1, 1

    key = jax.random.PRNGKey(0)
    kx, kw, kb = jax.random.split(key, 3)
    x = jax.random.normal(kx, (N, Cin, L), dtype=jnp.float32)
    # Deterministic Conv1d-like init (kaiming-uniform-ish bound).
    bound = 1.0 / np.sqrt(Cin * K)
    w = jax.random.uniform(kw, (Cout, Cin, K), jnp.float32, -bound, bound)
    b = jax.random.uniform(kb, (Cout,), jnp.float32, -bound, bound)
    # BatchNorm1d affine params at their PyTorch init values.
    gamma = jnp.ones((Cout,), jnp.float32)
    beta = jnp.zeros((Cout,), jnp.float32)

    out = jax.block_until_ready(
        conv_block(x, w, b, gamma, beta, stride=stride, dilation=dilation))

    # Reference still applies the conv bias; the allclose check verifies the
    # bias-cancellation-by-training-mode-BN argument numerically.
    ref = jax.block_until_ready(
        reference(x, w, b, gamma, beta, stride=stride, dilation=dilation))
    np.testing.assert_allclose(np.asarray(out), np.asarray(ref), rtol=1e-4, atol=1e-4)

    print("KERNEL_OK")
</pallas_src>

<mosaic_0001>
module attributes {stable_mosaic.version = 11 : i64} {
  func.func @conv_bn_relu_kernel(%arg0: i32, %arg1: memref<12x128xf32, #tpu.memory_space<vmem>>, %arg2: memref<8x12xf32, #tpu.memory_space<vmem>>, %arg3: memref<8x2xf32, #tpu.memory_space<vmem>>, %arg4: memref<8x128xf32, #tpu.memory_space<vmem>>) attributes {dimension_semantics = [#tpu.dimension_semantics<parallel>], iteration_bounds = array<i64: 1>, scalar_prefetch = 0 : i64, scratch_operands = 0 : i64, tpu.core_type = #tpu.core_type<tc>, window_params = [{pipeline_mode = #tpu.pipeline_mode<synchronous>, transform_indices = @transform_0, window_bounds = array<i64: 12, 128>}, {transform_indices = @transform_1, window_bounds = array<i64: 8, 12>}, {transform_indices = @transform_2, window_bounds = array<i64: 8, 2>}, {transform_indices = @transform_3, window_bounds = array<i64: 8, 128>}]} {
    %c0 = arith.constant 0 : index
    %c0_0 = arith.constant 0 : index
    %0 = vector.load %arg2[%c0, %c0_0] : memref<8x12xf32, #tpu.memory_space<vmem>>, vector<8x12xf32>
    %c0_1 = arith.constant 0 : index
    %c0_2 = arith.constant 0 : index
    %1 = vector.load %arg1[%c0_1, %c0_2] : memref<12x128xf32, #tpu.memory_space<vmem>>, vector<12x128xf32>
    %cst = arith.constant dense<0.000000e+00> : vector<8x128xf32>
    %2 = tpu.matmul %0, %1, %cst {dimension_numbers = #tpu.dot_dimension_numbers<[1], [0], [0], [1], [0, 0, 1, 1], [], []>} : vector<8x12xf32>, vector<12x128xf32>, vector<8x128xf32> -> vector<8x128xf32>
    %cst_3 = arith.constant dense<0.000000e+00> : vector<8xf32>
    %3 = vector.multi_reduction <add>, %2, %cst_3 [1] : vector<8x128xf32> to vector<8xf32>
    %4 = vector.shape_cast %3 : vector<8xf32> to vector<8x1xf32>
    %5 = arith.mulf %2, %2 : vector<8x128xf32>
    %cst_4 = arith.constant dense<0.000000e+00> : vector<8xf32>
    %6 = vector.multi_reduction <add>, %5, %cst_4 [1] : vector<8x128xf32> to vector<8xf32>
    %7 = vector.shape_cast %6 : vector<8xf32> to vector<8x1xf32>
    %cst_5 = arith.constant 0.0357142873 : f32
    %8 = vector.broadcast %cst_5 : f32 to vector<8x1xf32>
    %9 = arith.mulf %4, %8 : vector<8x1xf32>
    %cst_6 = arith.constant 0.0357142873 : f32
    %10 = vector.broadcast %cst_6 : f32 to vector<8x1xf32>
    %11 = arith.mulf %7, %10 : vector<8x1xf32>
    %12 = arith.mulf %9, %9 : vector<8x1xf32>
    %13 = arith.subf %11, %12 : vector<8x1xf32>
    %cst_7 = arith.constant 0.000000e+00 : f32
    %14 = vector.broadcast %cst_7 : f32 to vector<8x1xf32>
    %15 = arith.maximumf %13, %14 : vector<8x1xf32>
    %cst_8 = arith.constant 9.99999974E-6 : f32
    %16 = vector.broadcast %cst_8 : f32 to vector<8x1xf32>
    %17 = arith.addf %15, %16 : vector<8x1xf32>
    %18 = math.rsqrt %17 : vector<8x1xf32>
    %c0_9 = arith.constant 0 : index
    %c0_10 = arith.constant 0 : index
    %19 = vector.load %arg3[%c0_9, %c0_10] : memref<8x2xf32, #tpu.memory_space<vmem>>, vector<8x1xf32>
    %c0_11 = arith.constant 0 : index
    %c1 = arith.constant 1 : index
    %20 = vector.load %arg3[%c0_11, %c1] : memref<8x2xf32, #tpu.memory_space<vmem>>, vector<8x1xf32>
    %21 = arith.mulf %18, %19 : vector<8x1xf32>
    %22 = arith.mulf %9, %21 : vector<8x1xf32>
    %23 = arith.subf %20, %22 : vector<8x1xf32>
    %24 = vector.broadcast %21 : vector<8x1xf32> to vector<8x128xf32>
    %25 = arith.mulf %2, %24 : vector<8x128xf32>
    %26 = vector.broadcast %23 : vector<8x1xf32> to vector<8x128xf32>
    %27 = arith.addf %25, %26 : vector<8x128xf32>
    %cst_12 = arith.constant 0.000000e+00 : f32
    %28 = vector.broadcast %cst_12 : f32 to vector<8x128xf32>
    %29 = arith.maximumf %27, %28 : vector<8x128xf32>
    %c0_13 = arith.constant 0 : index
    %c0_14 = arith.constant 0 : index
    %30 = vector.load %arg4[%c0_13, %c0_14] : memref<8x128xf32, #tpu.memory_space<vmem>>, vector<8x128xf32>
    tpu.vector_store %arg4[%c0_13, %c0_14], %29 {strides = array<i32>} : memref<8x128xf32, #tpu.memory_space<vmem>>, vector<8x128xf32>,
    return
  }
  func.func @transform_0(%arg0: i32) -> (i32, i32) {
    %c0_i32 = arith.constant 0 : i32
    %c0_i32_0 = arith.constant 0 : i32
    %c0_i32_1 = arith.constant 0 : i32
    return %c0_i32, %c0_i32_0 : i32, i32
  }
  func.func @transform_1(%arg0: i32) -> (i32, i32) {
    %c0_i32 = arith.constant 0 : i32
    %c0_i32_0 = arith.constant 0 : i32
    return %arg0, %c0_i32 : i32, i32
  }
  func.func @transform_2(%arg0: i32) -> (i32, i32) {
    %c0_i32 = arith.constant 0 : i32
    %c0_i32_0 = arith.constant 0 : i32
    return %arg0, %c0_i32 : i32, i32
  }
  func.func @transform_3(%arg0: i32) -> (i32, i32) {
    %c0_i32 = arith.constant 0 : i32
    %c0_i32_0 = arith.constant 0 : i32
    return %arg0, %c0_i32 : i32, i32
  }
}

</mosaic_0001>

<bundles_post_ra>
// kernel: conv_block.1
= control target key start
LH: loop header
LB: loop body
LE: loop exit
PB: predicated region body
PF: predicated region fallthrough
CT: control target
= control target key end

     0   :  { %vm21_vm0 = vcmask 1043456   ;;  %v160_v0 = vmov 0.0|0.0   ;;  %vm161_vm1 = vmmov 1   ;;  %vm162_vm3 = vmmov 0   ;;  %s166_s18 = smov 1   ;;  %s202_s0 = inlined_call_operand.vmem [shape: f32[12,128], index: 0, kind: input, shape index: {}]   ;;  %s203_s1 = inlined_call_operand.vmem [shape: f32[8,12], index: 1, kind: input, shape index: {}]   ;;  %s204_s2 = inlined_call_operand.vmem [shape: f32[8,2], index: 2, kind: input, shape index: {}]   ;;  %s205_s3 = inlined_call_operand.vmem [shape: f32[8,128], index: 3, kind: output, shape index: {}]  }
   0x1   :  { %145 = vmatprep.subr.bf16.mxu0 %v160_v0  ;;  %v15_v1 = vld [vmem:[%s202_s0] sm:$0xff]  ;;  %v16_v2 = vld [vmem:[%s202_s0 + $0x8] sm:$0xf]  ;;  %vm147_vm2 = vmpackc.low %vm21_vm0, %vm161_vm1  ;;  %v163_v4 = vmov 0.0   ;;  %vm17_vm4 = vcmask 97280   ;;  %v164_v9 = vmov 0  }
   0x2   :  { %v146_v3 = vpack.c.bf16 %v16_v2, %v15_v1  ;;  %142 = vmatprep.mubr.msk.f32.mxu0 %vm162_vm3, %v163_v4  ;;  %v14_v5 = vld [vmem:[%s203_s1] sm:$0xff]  ;;  %156 = vset.pattern.permute.xlu1 %v164_v9  ;;  %v165_v18 = vmov 1  }
   0x3   :  { %157 = vset.pattern.permute.xlu0 %v165_v18  ;;  %v107_v19 = vld [vmem:[%s204_s2] sm:$0xff] }
   0x4   :  { %148 = vmatpush3.bf16.msk.msra.mxu0 %vm147_vm2, %v146_v3 }
   0x7   :  { %143 = vmatmul.mubr.msk.f32.vlgmr.msra.gmra.mrb[0].mxu0 %vm17_vm4, %v14_v5 }
  0xda   :  { %v91_v6 = vpop.f32.mrb[0].mxu0 }
  0xdb   :  { %95 = vadd.xlane.f32.xlu0 %v91_v6  ;;  %v144_v7 = vpop.f32.mrb[1].mxu0  ;;  %v97_v8 = vmul.f32 %v91_v6, %v91_v6 }
  0xdf   :  { %98 = vadd.xlane.f32.xlu0 %v97_v8 }
 0x168   :  { %v96_v10 = vpop.xlane.xlu0 %95 }
 0x169   :  { %v100_v11 = vmul.f32 0.035714287, %v96_v10 }
 0x16b   :  { %v102_v13 = vmul.f32 %v100_v11, %v100_v11 }
 0x16c   :  { %v99_v12 = vpop.xlane.xlu0 %98 }
 0x16d   :  { %v101_v14 = vmul.f32 0.035714287, %v99_v12 }
 0x16f   :  { %v103_v15 = vsub.f32 %v101_v14, %v102_v13 }
 0x171   :  { %v104_v16 = vmax.f32 %v103_v15, 0.0 }
 0x173   :  { %v105_v17 = vadd.f32 1e-05, %v104_v16 }
 0x175   :  { %158 = vrsqrt.f32 %v105_v17 }
 0x17f   :  { %v159_v20 = vpop.eup %158 }
 0x180   :  { %v108_v21 = vmul.f32 %v159_v20, %v107_v19 }
 0x182   :  { %v109_v22 = vmul.f32 %v108_v21, %v100_v11 }
 0x184   :  { %111 = vrot.lane.b32.xlu1 %v109_v22, %s166_s18 }
 0x188   :  { %117 = vperm.xlu1 %156, %v108_v21  }
 0x1f6   :  { %v112_v23 = vpop.permute.xlu1 %111 }
 0x1f7   :  { %v114_v24 = vsub.f32 %v107_v19, %v112_v23 }
 0x1f9   :  { %123 = vperm.xlu0 %157, %v114_v24  }
 0x207   :  { %v118_v25 = vpop.permute.xlu1 %117 }
 0x208   :  { %v120_v26 = vmul.f32 %v118_v25, %v91_v6 }
 0x278   :  { %v124_v27 = vpop.permute.xlu0 %123 }
 0x279   :  { %v126_v28 = vadd.f32 %v124_v27, %v120_v26 }
 0x27b   :  { %v127_v29 = vmax.f32 %v126_v28, 0.0 }
 0x27d   :  { %128 = vst [vmem:[%s205_s3] sm:$0xff] %v127_v29 }

</bundles_post_ra>
